<compile_context>
chip_gen: v5e
topology: v5e:2x2
jax: 0.10.0
libtpu: 0.0.40
codegen_flags: <defaults>
</compile_context>

<pallas_src>
import functools

import jax
import jax.numpy as jnp
from jax.experimental import pallas as pl
from jax.experimental.pallas import tpu as pltpu


def dueling_dqn_kernel(num_layer, compute_dtype, *refs):
    if num_layer > 1:
        (x_ref, feat_w0_ref, feat_wr_ref, feat_b_ref,
         head_h_w_ref, head_h_b_ref, head_o_w_ref, head_o_b_ref,
         out_ref) = refs
    else:
        (x_ref, feat_w0_ref, feat_b_ref,
         head_h_w_ref, head_h_b_ref, head_o_w_ref, head_o_b_ref,
         out_ref) = refs
        feat_wr_ref = None

    b_all = feat_b_ref[...]                      # (L, dh), f32

    def mm(h, w):                                # MXU matmul, f32 accumulate
        return jnp.dot(h.astype(compute_dtype), w,
                       preferred_element_type=jnp.float32)

    # Feature extractor: num_layer x (Linear -> ReLU).  num_layer is a Python
    # int so the loop unrolls at trace time; all slab indices are static.
    h = jnp.maximum(mm(x_ref[...], feat_w0_ref[...]) + b_all[0:1, :], 0.0)
    for i in range(1, num_layer):
        h = jnp.maximum(mm(h, feat_wr_ref[i - 1]) + b_all[i:i + 1, :], 0.0)

    # Fused [value_hidden | advantage_hidden] layer: one (dh, 2*dh) matmul.
    va = jnp.maximum(mm(h, head_h_w_ref[...]) + head_h_b_ref[...], 0.0)

    # Fused output layer with the dueling aggregation folded into the weights:
    #   out = va @ W_q + b_q  ==  value + advantage - mean(advantage)
    out_ref[...] = (mm(va, head_o_w_ref[...])
                    + head_o_b_ref[...]).astype(out_ref.dtype)


def pack_params(params, num_layer, dim_in, dim_hidden, num_actions,
                compute_dtype):
    """Pack per-layer params into a few VMEM-resident slabs."""
    idx = 0
    feat = []
    for _ in range(num_layer):
        feat.append((params[idx], params[idx + 1]))
        idx += 2
    vw0, vb0, vw1, vb1 = params[idx:idx + 4]
    idx += 4
    aw0, ab0, aw1, ab1 = params[idx:idx + 4]

    dh = dim_hidden

    # Layer 0 keeps its native (dim_in, dh) width so x is streamed un-padded.
    feat_w0 = feat[0][0].astype(compute_dtype)                   # (dim_in, dh)
    feat_wr = None
    if num_layer > 1:
        feat_wr = jnp.stack(
            [w for (w, _) in feat[1:]]).astype(compute_dtype)    # (L-1, dh, dh)
    feat_b = jnp.concatenate([b for (_, b) in feat], axis=0)     # (L, dh) f32

    # Fused head hidden layer.
    head_h_w = jnp.concatenate([vw0, aw0], axis=1).astype(compute_dtype)  # (dh, 2dh)
    head_h_b = jnp.concatenate([vb0, ab0], axis=1)                        # (1, 2dh) f32

    # Fused output layer with the dueling aggregation folded in:
    #   q_j = v@vw1 + a@(aw1[:,j] - mean_k aw1[:,k]) + (vb1 + ab1[j] - mean_k ab1[k])
    a = num_actions
    w_val = jnp.broadcast_to(vw1, (dh, a))                       # value -> every action col
    w_adv = aw1 - jnp.mean(aw1, axis=1, keepdims=True)           # centered advantage weights
    head_o_w = jnp.concatenate([w_val, w_adv], axis=0).astype(compute_dtype)  # (2dh, A)
    head_o_b = vb1 + ab1 - jnp.mean(ab1, axis=1, keepdims=True)               # (1, A) f32

    return feat_w0, feat_wr, feat_b, head_h_w, head_h_b, head_o_w, head_o_b


def dueling_dqn_forward(x, params, num_layer, *, batch_tile=1024,
                        compute_dtype=jnp.float32,
                        single_buffer_weights=None):
    """x: (B, dim_in) f32.  params: flat list [W0,b0,...,vW0,vb0,vW1,vb1,
    aW0,ab0,aW1,ab1] with W stored as (in, out) and b as (1, out)."""
    batch, dim_in = x.shape
    dim_hidden = params[0].shape[1]
    num_actions = params[-1].shape[-1]

    (feat_w0, feat_wr, feat_b, head_h_w, head_h_b, head_o_w,
     head_o_b) = pack_params(params, num_layer, dim_in, dim_hidden,
                             num_actions, compute_dtype)

    x = x.astype(compute_dtype)     # bf16 halves the dominant HBM stream

    # Batch tile: full batch for tiny inputs, otherwise a multiple of 8 chosen
    # so large batches always yield >= 2 grid steps (v7x dual-TC sharding).
    assert batch_tile % 8 == 0
    if batch <= 8:
        tb = batch                  # block == full dim, no (8,128) issue
    else:
        half = ((-(-batch // 2)) + 7) // 8 * 8
        tb = max(8, min(batch_tile, half))
    grid = (pl.cdiv(batch, tb),)
    # NOTE: the final partial x tile reads out-of-bounds rows; benign because
    # there is no cross-row reduction and Pallas masks the OOB output writes.

    weight_slabs = ([feat_w0] + ([feat_wr] if num_layer > 1 else [])
                    + [feat_b, head_h_w, head_h_b, head_o_w, head_o_b])
    weight_bytes = sum(int(w.size) * w.dtype.itemsize for w in weight_slabs)

    if single_buffer_weights is None:
        # Only worth single-buffering when the resident slabs are big enough
        # to threaten VMEM headroom (v7x: 64 MiB physical).
        single_buffer_weights = weight_bytes > (4 << 20)

    def weight_spec(shape):
        idx_map = lambda i: (0,) * len(shape)
        if single_buffer_weights:
            return pl.BlockSpec(shape, idx_map, pipeline_mode=pl.Buffered(1))
        return pl.BlockSpec(shape, idx_map)

    # Explicit VMEM budget: weights (x1 or x2) + double-buffered x/out tiles.
    weight_buf = 1 if single_buffer_weights else 2
    io_bytes = 2 * (tb * dim_in * x.dtype.itemsize + tb * num_actions * 4)
    need = weight_buf * weight_bytes + io_bytes
    vmem_limit = int(min(max(2 * need + (1 << 20), 16 << 20), 128 << 20))

    in_specs = ([pl.BlockSpec((tb, dim_in), lambda i: (i, 0))]
                + [weight_spec(w.shape) for w in weight_slabs])

    kernel = functools.partial(dueling_dqn_kernel, num_layer, compute_dtype)
    return pl.pallas_call(
        kernel,
        out_shape=jax.ShapeDtypeStruct((batch, num_actions), jnp.float32),
        grid=grid,
        in_specs=in_specs,
        out_specs=pl.BlockSpec((tb, num_actions), lambda i: (i, 0)),
        compiler_params=pltpu.CompilerParams(
            dimension_semantics=("parallel",),
            vmem_limit_bytes=vmem_limit),
    )(x, *weight_slabs)


def init_params(key, dim_in, dim_hidden, num_actions, num_layer):
    """PyTorch nn.Linear-style init; W stored as (in, out), b as (1, out)."""
    def linear(key, fan_in, fan_out):
        kw, kb = jax.random.split(key)
        bound = 1.0 / jnp.sqrt(jnp.float32(fan_in))
        w = jax.random.uniform(kw, (fan_in, fan_out), jnp.float32, -bound, bound)
        b = jax.random.uniform(kb, (1, fan_out), jnp.float32, -bound, bound)
        return w, b

    params = []
    for i in range(num_layer):
        key, sub = jax.random.split(key)
        fin = dim_in if i == 0 else dim_hidden
        w, b = linear(sub, fin, dim_hidden)
        params += [w, b]
    key, sub = jax.random.split(key)
    w, b = linear(sub, dim_hidden, dim_hidden)       # value hidden
    params += [w, b]
    key, sub = jax.random.split(key)
    w, b = linear(sub, dim_hidden, 1)                # value out
    params += [w, b]
    key, sub = jax.random.split(key)
    w, b = linear(sub, dim_hidden, dim_hidden)       # advantage hidden
    params += [w, b]
    key, sub = jax.random.split(key)
    w, b = linear(sub, dim_hidden, num_actions)      # advantage out
    params += [w, b]
    return params


def reference_forward(x, params, num_layer):
    """Pure-JAX reference of the PyTorch forward (unfused)."""
    idx = 0
    h = x
    for _ in range(num_layer):
        w, b = params[idx], params[idx + 1]
        idx += 2
        h = jnp.maximum(h @ w + b, 0.0)
    vw0, vb0, vw1, vb1 = params[idx:idx + 4]
    idx += 4
    aw0, ab0, aw1, ab1 = params[idx:idx + 4]
    value = jnp.maximum(h @ vw0 + vb0, 0.0) @ vw1 + vb1
    adv = jnp.maximum(h @ aw0 + ab0, 0.0) @ aw1 + ab1
    return value + adv - adv.mean(axis=-1, keepdims=True)


if __name__ == "__main__":
    batch, dim_in, dim_hidden, num_actions, num_layer = 2, 16, 32, 8, 2

    key = jax.random.PRNGKey(0)
    key, xk = jax.random.split(key)
    x = jax.random.normal(xk, (batch, dim_in), jnp.float32)
    params = init_params(key, dim_in, dim_hidden, num_actions, num_layer)

    q = jax.block_until_ready(dueling_dqn_forward(x, params, num_layer))
    q_ref = reference_forward(x, params, num_layer)
    assert q.shape == (batch, num_actions)
    assert jnp.allclose(q, q_ref, atol=1e-5, rtol=1e-5), (q, q_ref)

    # Multi-tile batch grid with a partial final tile.
    key, xk2 = jax.random.split(key)
    x2 = jax.random.normal(xk2, (20, dim_in), jnp.float32)
    q2_ref = reference_forward(x2, params, num_layer)
    q2 = jax.block_until_ready(
        dueling_dqn_forward(x2, params, num_layer, batch_tile=8))
    assert jnp.allclose(q2, q2_ref, atol=1e-5, rtol=1e-5), (q2, q2_ref)

    # bf16 MXU-operand path (f32 accumulation), looser tolerance.
    q3 = jax.block_until_ready(
        dueling_dqn_forward(x2, params, num_layer,
                            compute_dtype=jnp.bfloat16))
    assert jnp.allclose(q3, q2_ref, atol=5e-2, rtol=5e-2), (q3, q2_ref)

    # num_layer == 1 exercises the no-rest-slab kernel arity.
    params1 = init_params(jax.random.PRNGKey(1), dim_in, dim_hidden,
                          num_actions, 1)
    q4 = jax.block_until_ready(dueling_dqn_forward(x, params1, 1))
    q4_ref = reference_forward(x, params1, 1)
    assert jnp.allclose(q4, q4_ref, atol=1e-5, rtol=1e-5), (q4, q4_ref)

    print("KERNEL_OK")
</pallas_src>

<mosaic_0001>
module attributes {stable_mosaic.version = 11 : i64} {
  func.func @dueling_dqn_kernel(%arg0: i32, %arg1: memref<2x16xf32, #tpu.memory_space<vmem>>, %arg2: memref<16x32xf32, #tpu.memory_space<vmem>>, %arg3: memref<1x32x32xf32, #tpu.memory_space<vmem>>, %arg4: memref<2x32xf32, #tpu.memory_space<vmem>>, %arg5: memref<32x64xf32, #tpu.memory_space<vmem>>, %arg6: memref<1x64xf32, #tpu.memory_space<vmem>>, %arg7: memref<64x8xf32, #tpu.memory_space<vmem>>, %arg8: memref<1x8xf32, #tpu.memory_space<vmem>>, %arg9: memref<2x8xf32, #tpu.memory_space<vmem>>) attributes {dimension_semantics = [#tpu.dimension_semantics<parallel>], iteration_bounds = array<i64: 1>, scalar_prefetch = 0 : i64, scratch_operands = 0 : i64, tpu.core_type = #tpu.core_type<tc>, window_params = [{transform_indices = @transform_0, window_bounds = array<i64: 2, 16>}, {pipeline_mode = #tpu.pipeline_mode<synchronous>, transform_indices = @transform_1, window_bounds = array<i64: 16, 32>}, {pipeline_mode = #tpu.pipeline_mode<synchronous>, transform_indices = @transform_2, window_bounds = array<i64: 1, 32, 32>}, {pipeline_mode = #tpu.pipeline_mode<synchronous>, transform_indices = @transform_3, window_bounds = array<i64: 2, 32>}, {pipeline_mode = #tpu.pipeline_mode<synchronous>, transform_indices = @transform_4, window_bounds = array<i64: 32, 64>}, {pipeline_mode = #tpu.pipeline_mode<synchronous>, transform_indices = @transform_5, window_bounds = array<i64: 1, 64>}, {pipeline_mode = #tpu.pipeline_mode<synchronous>, transform_indices = @transform_6, window_bounds = array<i64: 64, 8>}, {pipeline_mode = #tpu.pipeline_mode<synchronous>, transform_indices = @transform_7, window_bounds = array<i64: 1, 8>}, {transform_indices = @transform_8, window_bounds = array<i64: 2, 8>}]} {
    %c0 = arith.constant 0 : index
    %c0_0 = arith.constant 0 : index
    %0 = vector.load %arg4[%c0, %c0_0] : memref<2x32xf32, #tpu.memory_space<vmem>>, vector<2x32xf32>
    %c0_1 = arith.constant 0 : index
    %c0_2 = arith.constant 0 : index
    %1 = vector.load %arg1[%c0_1, %c0_2] : memref<2x16xf32, #tpu.memory_space<vmem>>, vector<2x16xf32>
    %c0_3 = arith.constant 0 : index
    %c0_4 = arith.constant 0 : index
    %2 = vector.load %arg2[%c0_3, %c0_4] : memref<16x32xf32, #tpu.memory_space<vmem>>, vector<16x32xf32>
    %cst = arith.constant dense<0.000000e+00> : vector<2x32xf32>
    %3 = tpu.matmul %1, %2, %cst {dimension_numbers = #tpu.dot_dimension_numbers<[1], [0], [0], [1], [0, 0, 1, 1], [], []>} : vector<2x16xf32>, vector<16x32xf32>, vector<2x32xf32> -> vector<2x32xf32>
    %4 = vector.extract_strided_slice %0 {offsets = [0, 0], sizes = [1, 32], strides = [1, 1]} : vector<2x32xf32> to vector<1x32xf32>
    %5 = vector.broadcast %4 : vector<1x32xf32> to vector<2x32xf32>
    %6 = arith.addf %3, %5 : vector<2x32xf32>
    %cst_5 = arith.constant 0.000000e+00 : f32
    %7 = vector.broadcast %cst_5 : f32 to vector<2x32xf32>
    %8 = arith.maximumf %6, %7 : vector<2x32xf32>
    %c0_6 = arith.constant 0 : index
    %c0_7 = arith.constant 0 : index
    %c0_8 = arith.constant 0 : index
    %9 = vector.load %arg3[%c0_6, %c0_7, %c0_8] : memref<1x32x32xf32, #tpu.memory_space<vmem>>, vector<1x32x32xf32>
    %10 = vector.shape_cast %9 : vector<1x32x32xf32> to vector<32x32xf32>
    %cst_9 = arith.constant dense<0.000000e+00> : vector<2x32xf32>
    %11 = tpu.matmul %8, %10, %cst_9 {dimension_numbers = #tpu.dot_dimension_numbers<[1], [0], [0], [1], [0, 0, 1, 1], [], []>} : vector<2x32xf32>, vector<32x32xf32>, vector<2x32xf32> -> vector<2x32xf32>
    %12 = vector.extract_strided_slice %0 {offsets = [1, 0], sizes = [1, 32], strides = [1, 1]} : vector<2x32xf32> to vector<1x32xf32>
    %13 = vector.broadcast %12 : vector<1x32xf32> to vector<2x32xf32>
    %14 = arith.addf %11, %13 : vector<2x32xf32>
    %cst_10 = arith.constant 0.000000e+00 : f32
    %15 = vector.broadcast %cst_10 : f32 to vector<2x32xf32>
    %16 = arith.maximumf %14, %15 : vector<2x32xf32>
    %c0_11 = arith.constant 0 : index
    %c0_12 = arith.constant 0 : index
    %17 = vector.load %arg5[%c0_11, %c0_12] : memref<32x64xf32, #tpu.memory_space<vmem>>, vector<32x64xf32>
    %cst_13 = arith.constant dense<0.000000e+00> : vector<2x64xf32>
    %18 = tpu.matmul %16, %17, %cst_13 {dimension_numbers = #tpu.dot_dimension_numbers<[1], [0], [0], [1], [0, 0, 1, 1], [], []>} : vector<2x32xf32>, vector<32x64xf32>, vector<2x64xf32> -> vector<2x64xf32>
    %c0_14 = arith.constant 0 : index
    %c0_15 = arith.constant 0 : index
    %19 = vector.load %arg6[%c0_14, %c0_15] : memref<1x64xf32, #tpu.memory_space<vmem>>, vector<1x64xf32>
    %20 = vector.broadcast %19 : vector<1x64xf32> to vector<2x64xf32>
    %21 = arith.addf %18, %20 : vector<2x64xf32>
    %cst_16 = arith.constant 0.000000e+00 : f32
    %22 = vector.broadcast %cst_16 : f32 to vector<2x64xf32>
    %23 = arith.maximumf %21, %22 : vector<2x64xf32>
    %c0_17 = arith.constant 0 : index
    %c0_18 = arith.constant 0 : index
    %24 = vector.load %arg7[%c0_17, %c0_18] : memref<64x8xf32, #tpu.memory_space<vmem>>, vector<64x8xf32>
    %cst_19 = arith.constant dense<0.000000e+00> : vector<2x8xf32>
    %25 = tpu.matmul %23, %24, %cst_19 {dimension_numbers = #tpu.dot_dimension_numbers<[1], [0], [0], [1], [0, 0, 1, 1], [], []>} : vector<2x64xf32>, vector<64x8xf32>, vector<2x8xf32> -> vector<2x8xf32>
    %c0_20 = arith.constant 0 : index
    %c0_21 = arith.constant 0 : index
    %26 = vector.load %arg8[%c0_20, %c0_21] : memref<1x8xf32, #tpu.memory_space<vmem>>, vector<1x8xf32>
    %27 = vector.broadcast %26 : vector<1x8xf32> to vector<2x8xf32>
    %28 = arith.addf %25, %27 : vector<2x8xf32>
    %c0_22 = arith.constant 0 : index
    %c0_23 = arith.constant 0 : index
    %29 = vector.load %arg9[%c0_22, %c0_23] : memref<2x8xf32, #tpu.memory_space<vmem>>, vector<2x8xf32>
    tpu.vector_store %arg9[%c0_22, %c0_23], %28 {strides = array<i32>} : memref<2x8xf32, #tpu.memory_space<vmem>>, vector<2x8xf32>,
    return
  }
  func.func @transform_0(%arg0: i32) -> (i32, i32) {
    %c0_i32 = arith.constant 0 : i32
    %c0_i32_0 = arith.constant 0 : i32
    return %arg0, %c0_i32 : i32, i32
  }
  func.func @transform_1(%arg0: i32) -> (i32, i32) {
    %c0_i32 = arith.constant 0 : i32
    %c0_i32_0 = arith.constant 0 : i32
    %c0_i32_1 = arith.constant 0 : i32
    return %c0_i32, %c0_i32_0 : i32, i32
  }
  func.func @transform_2(%arg0: i32) -> (i32, i32, i32) {
    %c0_i32 = arith.constant 0 : i32
    %c0_i32_0 = arith.constant 0 : i32
    %c0_i32_1 = arith.constant 0 : i32
    %c0_i32_2 = arith.constant 0 : i32
    return %c0_i32, %c0_i32_0, %c0_i32_1 : i32, i32, i32
  }
  func.func @transform_3(%arg0: i32) -> (i32, i32) {
    %c0_i32 = arith.constant 0 : i32
    %c0_i32_0 = arith.constant 0 : i32
    %c0_i32_1 = arith.constant 0 : i32
    return %c0_i32, %c0_i32_0 : i32, i32
  }
  func.func @transform_4(%arg0: i32) -> (i32, i32) {
    %c0_i32 = arith.constant 0 : i32
    %c0_i32_0 = arith.constant 0 : i32
    %c0_i32_1 = arith.constant 0 : i32
    return %c0_i32, %c0_i32_0 : i32, i32
  }
  func.func @transform_5(%arg0: i32) -> (i32, i32) {
    %c0_i32 = arith.constant 0 : i32
    %c0_i32_0 = arith.constant 0 : i32
    %c0_i32_1 = arith.constant 0 : i32
    return %c0_i32, %c0_i32_0 : i32, i32
  }
  func.func @transform_6(%arg0: i32) -> (i32, i32) {
    %c0_i32 = arith.constant 0 : i32
    %c0_i32_0 = arith.constant 0 : i32
    %c0_i32_1 = arith.constant 0 : i32
    return %c0_i32, %c0_i32_0 : i32, i32
  }
  func.func @transform_7(%arg0: i32) -> (i32, i32) {
    %c0_i32 = arith.constant 0 : i32
    %c0_i32_0 = arith.constant 0 : i32
    %c0_i32_1 = arith.constant 0 : i32
    return %c0_i32, %c0_i32_0 : i32, i32
  }
  func.func @transform_8(%arg0: i32) -> (i32, i32) {
    %c0_i32 = arith.constant 0 : i32
    %c0_i32_0 = arith.constant 0 : i32
    return %arg0, %c0_i32 : i32, i32
  }
}

</mosaic_0001>

<bundles_post_ra>
// kernel: tpu_custom_call.1
= control target key start
LH: loop header
LB: loop body
LE: loop exit
PB: predicated region body
PF: predicated region fallthrough
CT: control target
= control target key end

     0   :  { %13 = vsyncpa [#allocation3], 0  ;;  %s372_s0 = inlined_call_operand.vmem [shape: f32[2,16], index: 0, kind: input, shape index: {}]   ;;  %s373_s1 = inlined_call_operand.hbm [shape: f32[16,32], index: 1, kind: input, shape index: {}]   ;;  %s374_s2 = inlined_call_operand.vmem [shape: f32[1,32,32], index: 2, kind: input, shape index: {}]   ;;  %s375_s3 = inlined_call_operand.vmem [shape: f32[2,32], index: 3, kind: input, shape index: {}]   ;;  %s376_s4 = inlined_call_operand.vmem [shape: f32[32,64], index: 4, kind: input, shape index: {}]   ;;  %s377_s5 = inlined_call_operand.vmem [shape: f32[1,64], index: 5, kind: input, shape index: {}]   ;;  %s378_s6 = inlined_call_operand.vmem [shape: f32[64,8], index: 6, kind: input, shape index: {}]   ;;  %s379_s7 = inlined_call_operand.vmem [shape: f32[1,8], index: 7, kind: input, shape index: {}]   ;;  %s380_s8 = inlined_call_operand.hbm [shape: f32[2,8], index: 8, kind: output, shape index: {}]  }
   0x1   :  { %14 = vsyncpa [#allocation4], 0  ;;  %s21_s29 = sshll.u32 %s373_s1, 4  ;;  %s255_s30 = smov [#allocation2]   ;;  %s22_s29 = int_to_ptr.hbm [resolvable:$true] %s21_s29 }
   0x2   :  { %s23_s9 = sshll.u32 %s255_s30, 4  ;;  %s256_s10 = smov 128   ;;  %s24_s9 = int_to_ptr.vmem [resolvable:$true] %s23_s9 }
   0x3   :  { %s257_s11 = smov 8  }
   0x4   :  { %29 = dma.hbm_to_vmem [thread:$0]  %s22_s29, 256, %s24_s9, [#allocation3], %s256_s10, %s256_s10, %s257_s11  }
   0x5   :  { %251 = dma.done.wait [#allocation3], 256  }
   0x6   :  { %252 = vsyncadd [#allocation3], 4294967040  ;;  %v49_v0 = vld [vmem:[#allocation2 + $0x8] sm:$0xff]  ;;  %v48_v1 = vld [vmem:[#allocation2] sm:$0xff]  ;;  %vm51_vm0 = vcmask 130048   ;;  %vm81_vm1 = vcmask 261120  }
   0x7   :  { %69 = vmatpush.msra.mxu0 %v49_v0  ;;  %v47_v2 = vld [vmem:[%s372_s0] sm:$0x3]  ;;  %v79_v3 = vld [vmem:[%s374_s2 + $0x18] sm:$0xff]  ;;  %v78_v4 = vld [vmem:[%s374_s2 + $0x10] sm:$0xff]  ;;  %vm150_vm2 = vcmask 523264   ;;  %s258_s23 = smov [#allocation5]  }
   0x8   :  { %97 = vmatpush.msra.mxu1 %v79_v3  ;;  %v77_v5 = vld [vmem:[%s374_s2 + $0x8] sm:$0xff]  ;;  %v76_v6 = vld [vmem:[%s374_s2] sm:$0xff]  ;;  %v109_v7 = vld [vmem:[%s376_s4 + $0x18] sm:$0xff]  ;;  %s181_s24 = sshll.u32 %s258_s23, 4  ;;  %vm174_vm3 = vcmask 58368   ;;  %s182_s24 = int_to_ptr.vmem [resolvable:$true] %s181_s24 }
   0x9   :  { %70 = vmatpush.msra.mxu0 %v48_v1  ;;  %129 = vmatpush.msra.mxu2 %v109_v7  ;;  %v46_v8 = vld [vmem:[%s375_s3] sm:$0x3]  ;;  %v108_v13 = vld [vmem:[%s376_s4 + $0x10] sm:$0xff]  ;;  %v107_v14 = vld [vmem:[%s376_s4 + $0x8] sm:$0xff] }
   0xa   :  { %193 = vmatmul.msk.f32.vlgmr.msra.gmra.mxu0 %vm51_vm0, %v47_v2  ;;  %98 = vmatpush.msra.mxu1 %v78_v4  ;;  %v50_v9 = vperm.slane %v46_v8, 0  ;;  %v106_v15 = vld [vmem:[%s376_s4] sm:$0xff]  ;;  %v145_v16 = vld [vmem:[%s378_s6 + $0x38] sm:$0xff]  ;;  %v144_v17 = vld [vmem:[%s378_s6 + $0x30] sm:$0xff]  ;;  %v80_v21 = vperm.slane %v46_v8, 1 }
   0xb   :  { %130 = vmatpush.msra.mxu2 %v108_v13  ;;  %162 = vmatpush.msra.mxu3 %v145_v16  ;;  %v143_v18 = vld [vmem:[%s378_s6 + $0x28] sm:$0xff]  ;;  %v142_v19 = vld [vmem:[%s378_s6 + $0x20] sm:$0xff]  ;;  %v141_v20 = vld [vmem:[%s378_s6 + $0x18] sm:$0xff] }
   0xc   :  { %99 = vmatpush.msra.mxu1 %v77_v5  ;;  %v140_v25 = vld [vmem:[%s378_s6 + $0x10] sm:$0xff]  ;;  %v139_v26 = vld [vmem:[%s378_s6 + $0x8] sm:$0xff]  ;;  %v138_v27 = vld [vmem:[%s378_s6] sm:$0xff]  ;;  %s183_s6 = sshll.u32 %s380_s8, 4  ;;  %s184_s6 = int_to_ptr.hbm [resolvable:$true] %s183_s6 }
   0xd   :  { %131 = vmatpush.msra.mxu2 %v107_v14  ;;  %163 = vmatpush.msra.mxu3 %v144_v17  ;;  %v201_v28 = vld [vmem:[%s377_s5] ss:$0 sm:$0xff] }
   0xe   :  { %100 = vmatpush.msra.mxu1 %v76_v6  ;;  %v202_v32 = vld [vmem:[%s379_s7] ss:$0 sm:$0xff] }
   0xf   :  { %132 = vmatpush.msra.mxu2 %v106_v15  ;;  %164 = vmatpush.msra.mxu3 %v143_v18 }
  0x11   :  { %165 = vmatpush.msra.mxu3 %v142_v19 }
  0x13   :  { %166 = vmatpush.msra.mxu3 %v141_v20 }
  0x15   :  { %167 = vmatpush.msra.mxu3 %v140_v25 }
  0x17   :  { %168 = vmatpush.msra.mxu3 %v139_v26 }
  0x19   :  { %169 = vmatpush.msra.mxu3 %v138_v27 }
  0x87   :  { %v72_v10 = vpop.f32.mrf.mxu0 }
  0x88   :  { %v73_v11 = vadd.f32 %v72_v10, %v50_v9 }
  0x8a   :  { %v75_v12 = vmax.f32 %v73_v11, 0.0 }
  0x8c   :  { %194 = vmatmul.msk.f32.vlgmr.msra.gmra.mxu1 %vm81_vm1, %v75_v12 }
 0x109   :  { %v102_v22 = vpop.f32.mrf.mxu1 }
 0x10a   :  { %v103_v23 = vadd.f32 %v102_v22, %v80_v21 }
 0x10c   :  { %v105_v24 = vmax.f32 %v103_v23, 0.0 }
 0x10e   :  { %195 = vmatmul.msk.f32.vlgmr.msra.gmra.mxu2 %vm81_vm1, %v105_v24 }
 0x191   :  { %v134_v29 = vpop.f32.mrf.mxu2 }
 0x192   :  { %v135_v30 = vadd.f32 %v201_v28, %v134_v29 }
 0x194   :  { %v137_v31 = vmax.f32 %v135_v30, 0.0 }
 0x196   :  { %196 = vmatmul.msk.f32.vlgmr.msra.gmra.mxu3 %vm150_vm2, %v137_v31 }
 0x219   :  { %v171_v33 = vpop.f32.mrf.mxu3 }
 0x21a   :  { %v172_v34 = vadd.f32 %v202_v32, %v171_v33 }
 0x21c   :  { %175 = vst.msk [vmem:[#allocation5] sm:$0x3] %vm174_vm3, %v172_v34 }
 0x21d   :  { %186 = dma.vmem_to_hbm [thread:$0]  %s182_s24, 32, %s184_s6, [#allocation4]  }
 0x21e   :  { %253 = dma.done.wait [#allocation4], 32  }
 0x21f   :  { %254 = vsyncadd [#allocation4], 4294967264 }
 0x220   :  { %191 = vsyncpa [#allocation3], 1 }
 0x221   :  { %192 = vsyncpa [#allocation4], 1 }

</bundles_post_ra>
